<compile_context>
chip_gen: v7x
topology: tpu7x:2x2x1
jax: 0.10.0
libtpu: 0.0.40
codegen_flags: <defaults>
</compile_context>

<pallas_src>
import functools

import jax
import jax.numpy as jnp
import numpy as np
from jax import lax
from jax.experimental import pallas as pl
from jax.experimental.pallas import tpu as pltpu


# ----------------------------------------------------------------------------
# Helpers
# ----------------------------------------------------------------------------
def _vmem_budget_bytes():
    """Per-TensorCore scoped-VMEM budget: ~80% of physical capacity.

    v5e/v6e: 128 MiB physical -> ~102 MiB budget (well above the 16/32 MiB
    default scoped limits).  v7x: 64 MiB per TC -> ~51 MiB budget, leaving
    headroom for Mosaic internal scratch.  Conservative 64 MiB capacity is
    assumed if the hardware query is unavailable.
    """
    cap = 64 << 20
    try:
        info = pltpu.get_tpu_info()
        cap = int(getattr(info, "vmem_capacity_bytes", cap) or cap)
    except Exception:
        pass
    return int(cap * 0.8)


def _const_spec(shape, index_map):
    """BlockSpec for a grid-invariant input: request single buffering (the block
    index never changes, so a second pipeline buffer is pure VMEM waste).
    Falls back to the default pipelined spec if Buffered(1) is unavailable."""
    try:
        return pl.BlockSpec(shape, index_map, pipeline_mode=pl.Buffered(1))
    except Exception:
        return pl.BlockSpec(shape, index_map)


def _tile_rows(n, target):
    """Pick a row tile (multiple of 8, <= target) and the padded row count.

    Never falls back to tm == n for large n (which would request an (n, n)
    output block in kernel 1): if no 8-aligned divisor of n exists below the
    target, the rows are padded instead."""
    if n <= target:
        return n, n                       # full-extent block is always legal
    t = max(8, target - target % 8)
    for tm in range(t, 7, -8):
        if n % tm == 0:
            return tm, n                  # aligned divisor, no padding needed
    tm = t
    n_pad = ((n + tm - 1) // tm) * tm
    return tm, n_pad


# ----------------------------------------------------------------------------
# Kernel 1: neighbor ranking scores (fused faiss IndexFlat-L2 "search" matmul)
#   score[i, j] = 2 * <d_i, d_j> - ||d_j||^2   (== ||d_i||^2 - ||d_i - d_j||^2)
# ----------------------------------------------------------------------------
def _score_kernel(q_ref, db_ref, dbn_ref, out_ref, *, mask_diag):
    # q_ref:   (tm, dim) bf16 query-row tile (pipelined)
    # db_ref:  (n, dim)  bf16 resident database (single-buffered, grid-invariant)
    # dbn_ref: (1, n)    f32 squared norms of the database rows
    # out_ref: (tm, n)   bf16 ranking scores
    dots = lax.dot_general(q_ref[...], db_ref[...], (((1,), (1,)), ((), ())),
                           preferred_element_type=jnp.float32)       # (tm, n) f32
    scores = 2.0 * dots - dbn_ref[...]
    if mask_diag:
        tm, n = scores.shape
        rows = pl.program_id(0) * tm + lax.broadcasted_iota(jnp.int32, (tm, n), 0)
        cols = lax.broadcasted_iota(jnp.int32, (tm, n), 1)
        scores = jnp.where(rows == cols, -jnp.inf, scores)           # drop self robustly
    out_ref[...] = scores.astype(out_ref.dtype)


def neighbor_scores(d, mask_diag, out_dtype=jnp.bfloat16):
    n, dim = d.shape
    budget = _vmem_budget_bytes()

    d32 = d.astype(jnp.float32)
    dbn = jnp.sum(d32 * d32, axis=-1).reshape(1, n)       # f32 database norms
    db = d.astype(jnp.bfloat16)                           # bf16-native MXU operands

    # Tile plan against the per-TC budget:
    #   resident db (1 buf, bf16) + dbn (1 buf) + 2x query tile + 2x output tile.
    out_b = jnp.dtype(out_dtype).itemsize
    resident = n * dim * 2 + n * 4
    headroom = 2 << 20
    tm_target = 8
    for cand in (512, 256, 128, 64, 32, 16, 8):
        if resident + 2 * cand * dim * 2 + 2 * cand * n * out_b + headroom <= budget:
            tm_target = cand
            break
    # TODO(synk): for n where the resident db itself exceeds the budget, also
    # tile the database (lane) axis with a fused running top-R in VMEM.
    tm, n_pad = _tile_rows(n, tm_target)
    q = db if n_pad == n else jnp.pad(db, ((0, n_pad - n), (0, 0)))

    kern = functools.partial(_score_kernel, mask_diag=mask_diag)
    scores = pl.pallas_call(
        kern,
        out_shape=jax.ShapeDtypeStruct((n_pad, n), out_dtype),
        grid_spec=pltpu.PrefetchScalarGridSpec(
            num_scalar_prefetch=0,
            grid=(n_pad // tm,),
            in_specs=[
                pl.BlockSpec((tm, dim), lambda i: (i, 0)),   # query row tile
                _const_spec((n, dim), lambda i: (0, 0)),     # resident database (1 buf)
                _const_spec((1, n), lambda i: (0, 0)),       # database sq-norms (1 buf)
            ],
            out_specs=pl.BlockSpec((tm, n), lambda i: (i, 0)),
        ),
        compiler_params=pltpu.CompilerParams(
            dimension_semantics=("parallel",),               # megacore-shard rows (v7x)
            vmem_limit_bytes=budget),
    )(q, db, dbn)
    return scores[:n] if n_pad != n else scores


# ----------------------------------------------------------------------------
# Kernel 2: per-metric SUMS over all queries from the binary-hit matrix.
#   metrics per query: [recall@k indicators..., r-precision, AP@R]
# ----------------------------------------------------------------------------
def _metrics_kernel(hits_ref, ri_ref, pos_ref, ipos_ref, tri_ref, out_ref,
                    acc_ref, *, ks, inv_map_r):
    i = pl.program_id(0)

    @pl.when(i == 0)
    def _():
        acc_ref[...] = jnp.zeros_like(acc_ref)

    hits = hits_ref[...]                                   # (tm, R) f32 0/1
    R = hits.shape[1]

    cols = []
    # recall@k: any same-class neighbor within the first k ranks (hits are 0/1,
    # so a max over the first k columns is the indicator -- no lane-axis scan).
    for k in ks:
        kk = min(int(k), R)
        cols.append(jnp.max(hits[:, :kk], axis=1, keepdims=True))

    # prefix sums via a triangular matmul on the otherwise idle MXU
    cum = lax.dot_general(hits, tri_ref[...], (((1,), (0,)), ((), ())),
                          preferred_element_type=jnp.float32)        # (tm, R)

    # r-precision: (# same-class hits within rank R_i) / R_i, guarded for R_i=0
    ri = ri_ref[...]                                       # (tm, 1)
    inv_ri = pl.reciprocal(jnp.maximum(ri, 1.0), approx=True)
    in_r = (pos_ref[...] <= ri).astype(jnp.float32)        # (tm, R)
    cols.append(jnp.sum(hits * in_r, axis=1, keepdims=True) * inv_ri)

    # MAP@R: (1/R) * sum_j precision@j * rel_j
    ap = jnp.sum(cum * ipos_ref[...] * hits, axis=1, keepdims=True) * inv_map_r
    cols.append(ap)

    per_q = jnp.concatenate(cols, axis=1)                  # (tm, n_metrics)
    acc_ref[...] += jnp.sum(per_q, axis=0, keepdims=True)

    @pl.when(i == pl.num_programs(0) - 1)
    def _():
        out_ref[...] = acc_ref[...]


def metric_sums(binary_hits, r_i, ks, map_r):
    n, R = binary_hits.shape
    n_metrics = len(ks) + 2
    # (n, R) is typically a few MiB: single grid step (or 2048-row tiles), so
    # per-step grid overhead and accumulator traffic effectively vanish.
    tm, n_pad = _tile_rows(n, 2048)
    if n_pad != n:
        binary_hits = jnp.pad(binary_hits, ((0, n_pad - n), (0, 0)))
        r_i = jnp.pad(r_i, ((0, n_pad - n), (0, 0)))       # zero rows contribute 0

    # Loop-invariant constants hoisted out of the kernel body (grid-invariant,
    # single-buffered inputs): rank positions, 1/rank, triangular matrix.
    pos = (jnp.arange(R, dtype=jnp.float32) + 1.0).reshape(1, R)
    inv_pos = 1.0 / pos
    tri = (lax.broadcasted_iota(jnp.int32, (R, R), 0)
           <= lax.broadcasted_iota(jnp.int32, (R, R), 1)).astype(jnp.float32)

    kern = functools.partial(_metrics_kernel, ks=tuple(int(k) for k in ks),
                             inv_map_r=1.0 / float(max(int(map_r), 1)))
    sums = pl.pallas_call(
        kern,
        out_shape=jax.ShapeDtypeStruct((1, n_metrics), jnp.float32),
        grid_spec=pltpu.PrefetchScalarGridSpec(
            num_scalar_prefetch=0,
            grid=(n_pad // tm,),
            in_specs=[
                pl.BlockSpec((tm, R), lambda i: (i, 0)),   # hit-matrix tile
                pl.BlockSpec((tm, 1), lambda i: (i, 0)),   # per-query R_i
                _const_spec((1, R), lambda i: (0, 0)),     # rank positions
                _const_spec((1, R), lambda i: (0, 0)),     # 1 / rank
                _const_spec((R, R), lambda i: (0, 0)),     # triangular matrix
            ],
            out_specs=pl.BlockSpec((1, n_metrics), lambda i: (0, 0)),
            scratch_shapes=[pltpu.VMEM((1, n_metrics), jnp.float32)],
        ),
        compiler_params=pltpu.CompilerParams(
            dimension_semantics=("arbitrary",)),
    )(binary_hits, r_i, pos, inv_pos, tri)
    return sums[0]


# ----------------------------------------------------------------------------
# Forward pass (mirrors ClassBasedEmbeddingMetrics.forward)
# ----------------------------------------------------------------------------
def class_based_embedding_metrics(d, c, ks=(1, 5, 10), r=None, ignore_self=True):
    d = jnp.asarray(d, jnp.float32)
    c_host = np.asarray(c)
    n = d.shape[0]

    # sizes_per_class(c) and the search rank R (static, from concrete labels)
    counts = np.bincount(c_host)
    class_sizes = counts[counts > 0]
    r_base = int(class_sizes.min()) - 1 if r is None else int(r)
    # Reference searches r_base+1 neighbors and drops the self column; masking
    # the diagonal inside kernel 1 (when ignore_self) gives the same R usable
    # ranks but is robust to exact ties / bf16 scores.
    R = int(r_base)

    # knn_index.add(d); knn_index.search(d, r): exact L2 ranking via the fused
    # bf16 score kernel; neighbor ordering via lax.top_k on the bf16 scores.
    scores = neighbor_scores(d, mask_diag=ignore_self)            # Pallas kernel 1
    _, inds = lax.top_k(scores, R)

    # get_binary_hits: c[inds] == c[i]
    c_dev = jnp.asarray(c_host, jnp.int32)
    binary_hits = (c_dev[inds] == c_dev[:, None]).astype(jnp.float32)   # (n, R)

    # per-query R_i gathered from the class-size bincount (no O(n^2) pass)
    r_i_np = counts[c_host] - (1 if ignore_self else 0)
    r_i = jnp.asarray(r_i_np, jnp.float32).reshape(n, 1)

    sums = metric_sums(binary_hits, r_i, ks, map_r=R)             # Pallas kernel 2
    means = sums / float(n)

    results = {}
    for i, k in enumerate(ks):
        results[f"recall@{k}"] = means[i]
    results["r-precision"] = means[len(ks)]
    results["map@r"] = means[len(ks) + 1]
    return results


if __name__ == "__main__":
    key = jax.random.PRNGKey(0)
    num_classes, n_per_class, dim = 4, 16, 32      # n = 64 samples, z_dim = 32
    n = num_classes * n_per_class

    k_centers, k_noise = jax.random.split(key)
    centers = 3.0 * jax.random.normal(k_centers, (num_classes, dim), dtype=jnp.float32)
    c = jnp.repeat(jnp.arange(num_classes, dtype=jnp.int32), n_per_class)
    d = centers[c] + 0.5 * jax.random.normal(k_noise, (n, dim), dtype=jnp.float32)

    results = class_based_embedding_metrics(d, c, ks=(1, 5, 10), r=None, ignore_self=True)
    results = {k: float(jax.block_until_ready(v)) for k, v in results.items()}
    # values available in `results`: recall@1, recall@5, recall@10, r-precision, map@r
    print("KERNEL_OK")
</pallas_src>

<mosaic_0001>
module attributes {stable_mosaic.version = 11 : i64} {
  func.func @_score_kernel(%arg0: i32, %arg1: memref<64x32xbf16, #tpu.memory_space<vmem>>, %arg2: memref<64x32xbf16, #tpu.memory_space<vmem>>, %arg3: memref<1x64xf32, #tpu.memory_space<vmem>>, %arg4: memref<64x64xbf16, #tpu.memory_space<vmem>>) attributes {dimension_semantics = [#tpu.dimension_semantics<parallel>], iteration_bounds = array<i64: 1>, scalar_prefetch = 0 : i64, scratch_operands = 0 : i64, tpu.core_type = #tpu.core_type<tc>, window_params = [{transform_indices = @transform_0, window_bounds = array<i64: 64, 32>}, {pipeline_mode = #tpu.pipeline_mode<synchronous>, transform_indices = @transform_1, window_bounds = array<i64: 64, 32>}, {pipeline_mode = #tpu.pipeline_mode<synchronous>, transform_indices = @transform_2, window_bounds = array<i64: 1, 64>}, {transform_indices = @transform_3, window_bounds = array<i64: 64, 64>}]} {
    %c0 = arith.constant 0 : index
    %c0_0 = arith.constant 0 : index
    %0 = vector.load %arg1[%c0, %c0_0] : memref<64x32xbf16, #tpu.memory_space<vmem>>, vector<64x32xbf16>
    %c0_1 = arith.constant 0 : index
    %c0_2 = arith.constant 0 : index
    %1 = vector.load %arg2[%c0_1, %c0_2] : memref<64x32xbf16, #tpu.memory_space<vmem>>, vector<64x32xbf16>
    %cst = arith.constant dense<0.000000e+00> : vector<64x64xf32>
    %2 = tpu.matmul %0, %1, %cst {dimension_numbers = #tpu.dot_dimension_numbers<[1], [1], [0], [0], [0, 0, 1, 0], [], []>} : vector<64x32xbf16>, vector<64x32xbf16>, vector<64x64xf32> -> vector<64x64xf32>
    %cst_3 = arith.constant 2.000000e+00 : f32
    %3 = vector.broadcast %cst_3 : f32 to vector<64x64xf32>
    %4 = arith.mulf %3, %2 : vector<64x64xf32>
    %c0_4 = arith.constant 0 : index
    %c0_5 = arith.constant 0 : index
    %5 = vector.load %arg3[%c0_4, %c0_5] : memref<1x64xf32, #tpu.memory_space<vmem>>, vector<1x64xf32>
    %6 = vector.broadcast %5 : vector<1x64xf32> to vector<64x64xf32>
    %7 = arith.subf %4, %6 : vector<64x64xf32>
    %c64_i32 = arith.constant 64 : i32
    %8 = arith.muli %arg0, %c64_i32 : i32
    %9 = tpu.iota {dimensions = array<i32: 0>} : vector<64x64xi32>
    %10 = vector.broadcast %8 : i32 to vector<64x64xi32>
    %11 = arith.addi %10, %9 : vector<64x64xi32>
    %12 = tpu.iota {dimensions = array<i32: 1>} : vector<64x64xi32>
    %13 = arith.cmpi eq, %11, %12 : vector<64x64xi32>
    %cst_6 = arith.constant 0xFF800000 : f32
    %14 = vector.broadcast %cst_6 : f32 to vector<64x64xf32>
    %15 = arith.select %13, %14, %7 : vector<64x64xi1>, vector<64x64xf32>
    %16 = arith.truncf %15 : vector<64x64xf32> to vector<64x64xbf16>
    %c0_7 = arith.constant 0 : index
    %c0_8 = arith.constant 0 : index
    %17 = vector.load %arg4[%c0_7, %c0_8] : memref<64x64xbf16, #tpu.memory_space<vmem>>, vector<64x64xbf16>
    tpu.vector_store %arg4[%c0_7, %c0_8], %16 {strides = array<i32>} : memref<64x64xbf16, #tpu.memory_space<vmem>>, vector<64x64xbf16>,
    return
  }
  func.func @transform_0(%arg0: i32) -> (i32, i32) {
    %c0_i32 = arith.constant 0 : i32
    %c0_i32_0 = arith.constant 0 : i32
    return %arg0, %c0_i32 : i32, i32
  }
  func.func @transform_1(%arg0: i32) -> (i32, i32) {
    %c0_i32 = arith.constant 0 : i32
    %c0_i32_0 = arith.constant 0 : i32
    %c0_i32_1 = arith.constant 0 : i32
    return %c0_i32, %c0_i32_0 : i32, i32
  }
  func.func @transform_2(%arg0: i32) -> (i32, i32) {
    %c0_i32 = arith.constant 0 : i32
    %c0_i32_0 = arith.constant 0 : i32
    %c0_i32_1 = arith.constant 0 : i32
    return %c0_i32, %c0_i32_0 : i32, i32
  }
  func.func @transform_3(%arg0: i32) -> (i32, i32) {
    %c0_i32 = arith.constant 0 : i32
    %c0_i32_0 = arith.constant 0 : i32
    return %arg0, %c0_i32 : i32, i32
  }
}

</mosaic_0001>

<bundles_post_ra>
// kernel: tpu_custom_call.1
= control target key start
LH: loop header
LB: loop body
LE: loop exit
PB: predicated region body
PF: predicated region fallthrough
CT: control target
= control target key end

     0   :  { %vm72_vm0 = vcmask 261120   ;;  %s495_s0 = inlined_call_operand.vmem [shape: bf16[64,32], index: 0, kind: input, shape index: {}]   ;;  %s496_s1 = inlined_call_operand.vmem [shape: bf16[64,32], index: 1, kind: input, shape index: {}]   ;;  %s497_s2 = inlined_call_operand.vmem [shape: f32[1,64], index: 2, kind: input, shape index: {}]   ;;  %s498_s3 = inlined_call_operand.hbm [shape: bf16[64,64], index: 3, kind: output, shape index: {}]  }
   0x1   :  { %v351_v0 = vld [vmem:[%s496_s1] sm:$0xff]   ;;  %v352_v1 = vld [vmem:[%s496_s1 + $0x8] sm:$0xff]   ;;  %v356_v4 = vld [vmem:[%s495_s0 + $0x10] sm:$0xff]  }
   0x2   :  { %340 = vmatprep.subr.msk.bf16.mxu0 %vm72_vm0, %v351_v0  ;;  %341 = vmatprep.subr.msk.bf16.mxu1 %vm72_vm0, %v351_v0  ;;  %v86_v2 = vsel %vm72_vm0, %v351_v0, 0  ;;  %v355_v3 = vld [vmem:[%s495_s0] sm:$0xff]   ;;  %v89_v5 = vsel %vm72_vm0, %v352_v1, 0  ;;  %v353_v6 = vld [vmem:[%s496_s1 + $0x10] sm:$0xff]  }
   0x3   :  { %317 = vmatpush3.bf16.xpose.msra.mxu0 %v86_v2  ;;  %336 = vmatpush3.bf16.xpose.msra.mxu1 %v86_v2 }
   0x4   :  { %342 = vmatprep.subr.msk.bf16.mxu0 %vm72_vm0, %v352_v1  ;;  %343 = vmatprep.subr.msk.bf16.mxu1 %vm72_vm0, %v352_v1 }
   0x5   :  { %324 = vmatprep.mubr.msk.bf16.mxu0 %vm72_vm0, %v355_v3  ;;  %328 = vmatprep.mubr.msk.bf16.mxu1 %vm72_vm0, %v356_v4 }
   0x6   :  { %8 = vsyncpa [#allocation3], 0  ;;  %v92_v7 = vsel %vm72_vm0, %v353_v6, 0  ;;  %v354_v8 = vld [vmem:[%s496_s1 + $0x18] sm:$0xff]   ;;  %v357_v10 = vld [vmem:[%s495_s0 + $0x8] sm:$0xff]   ;;  %v186_v12 = vlaneseq  ;;  %vm254_vm2 = vcmask 519168  }
   0x7   :  { %v95_v9 = vsel %vm72_vm0, %v354_v8, 0  ;;  %v358_v11 = vld [vmem:[%s495_s0 + $0x18] sm:$0xff]   ;;  %v291_v23 = vld [vmem:[%s497_s2] ss:$0 sm:$0xff]  ;;  %s383_s2 = smov [#allocation2]  }
   0x8   :  { %v187_v13 = vshrl.u32 %v186_v12, 7  ;;  %v446_v15 = vand.u32 127, %v186_v12  ;;  %s268_s28 = sshll.u32 %s383_s2, 4  ;;  %s269_s28 = int_to_ptr.vmem [resolvable:$true] %s268_s28 }
   0x9   :  { %s359_s29 = scalar_lea.vmem %s269_s28, 512  ;;  %p364_p1 = scmp.lt.s32.totalorder %s269_s28, %s269_s28 }
   0xa   :  { %v189_v14 = vadd.s32 16, %v187_v13  ;;  %v193_v16 = vadd.s32 48, %v187_v13  ;;  %v191_v17 = vadd.s32 32, %v187_v13  ;;  %v190_v18 = vadd.s32 24, %v187_v13  ;;  %p360_p0 = scmp.ne.s32.totalorder %s269_s28, %s359_s29  ;;  %p365_p2 = scmp.lt.s32.totalorder %s359_s29, %s359_s29 }
   0xb   :  { %319 = vmatpush3.bf16.xpose.msra.mxu0 %v89_v5  ;;  %337 = vmatpush3.bf16.xpose.msra.mxu1 %v89_v5  ;;  %v194_v19 = vadd.s32 56, %v187_v13  ;;  %v188_v20 = vadd.s32 8, %v187_v13  ;;  %v192_v21 = vadd.s32 40, %v187_v13  ;;  %vm206_vm4 = vcmp.eq.s32.totalorder %v187_v13, %v446_v15 }
   0xc   :  { %344 = vmatprep.subr.msk.bf16.mxu0 %vm72_vm0, %v353_v6  ;;  %345 = vmatprep.subr.msk.bf16.mxu1 %vm72_vm0, %v353_v6  ;;  %vm208_vm1 = vcmp.eq.s32.totalorder %v189_v14, %v446_v15  ;;  %vm212_vm3 = vcmp.eq.s32.totalorder %v193_v16, %v446_v15  ;;  %vm210_vm5 = vcmp.eq.s32.totalorder %v191_v17, %v446_v15  ;;  %p366_p3 = por %p365_p2, %p364_p1 }
   0xd   :  { %vm209_vm6 = vcmp.eq.s32.totalorder %v190_v18, %v446_v15  ;;  %vm213_vm7 = vcmp.eq.s32.totalorder %v194_v19, %v446_v15  ;;  %vm207_vm8 = vcmp.eq.s32.totalorder %v188_v20, %v446_v15  ;;  %vm211_vm9 = vcmp.eq.s32.totalorder %v192_v21, %v446_v15 }
   0xe   :  { %p367_p4 = pnand %p366_p3, %p360_p0 }
  0x13   :  { %321 = vmatpush3.bf16.xpose.msra.mxu0 %v92_v7  ;;  %338 = vmatpush3.bf16.xpose.msra.mxu1 %v92_v7 }
  0x14   :  { %346 = vmatprep.subr.msk.bf16.mxu0 %vm72_vm0, %v354_v8  ;;  %347 = vmatprep.subr.msk.bf16.mxu1 %vm72_vm0, %v354_v8 }
  0x1b   :  { %323 = vmatpush3.bf16.xpose.msra.mxu0 %v95_v9  ;;  %339 = vmatpush3.bf16.xpose.msra.mxu1 %v95_v9 }
  0x22   :  { %325 = vmatmul.mubr.msk.bf16.vlgmr.msra.gmra.mrb[0].mxu0 %vm72_vm0, %v357_v10  ;;  %329 = vmatmul.mubr.msk.bf16.vlgmr.msra.gmra.mrb[0].mxu1 %vm72_vm0, %v358_v11 }
  0xf5   :  { %v326_v22 = vpop.f32.mrb[0].mxu0  ;;  %v330_v24 = vpop.f32.mrb[0].mxu1 }
  0xf6   :  { %v164_v25 = vmul.f32 2.0, %v326_v22  ;;  %v168_v26 = vmul.f32 2.0, %v330_v24  ;;  %v131_v27 = vpop.f32.mrb[1].mxu0  ;;  %v147_v28 = vpop.f32.mrb[1].mxu1 }
  0xf7   :  { %v162_v29 = vmul.f32 2.0, %v131_v27  ;;  %v166_v30 = vmul.f32 2.0, %v147_v28  ;;  %v327_v31 = vpop.f32.mrb[2].mxu0  ;;  %v331_v32 = vpop.f32.mrb[2].mxu1 }
  0xf8   :  { %v179_v33 = vsub.f32 %v164_v25, %v291_v23  ;;  %v183_v34 = vsub.f32 %v168_v26, %v291_v23  ;;  %v165_v35 = vmul.f32 2.0, %v327_v31  ;;  %v169_v36 = vmul.f32 2.0, %v331_v32  ;;  %v134_v37 = vpop.f32.mrb[3].mxu0  ;;  %v150_v38 = vpop.f32.mrb[3].mxu1 }
  0xf9   :  { %v177_v39 = vsub.f32 %v162_v29, %v291_v23  ;;  %v181_v40 = vsub.f32 %v166_v30, %v291_v23  ;;  %v163_v41 = vmul.f32 2.0, %v134_v37  ;;  %v167_v42 = vmul.f32 2.0, %v150_v38 }
  0xfa   :  { %v216_v43 = vsel %vm208_vm1, -inf, %v179_v33  ;;  %v220_v44 = vsel %vm212_vm3, -inf, %v183_v34  ;;  %v180_v45 = vsub.f32 %v165_v35, %v291_v23  ;;  %v184_v46 = vsub.f32 %v169_v36, %v291_v23 }
  0xfb   :  { %v302_v47 = vpack.c.bf16 %v216_v43, %v216_v43  ;;  %v306_v48 = vpack.c.bf16 %v220_v44, %v220_v44  ;;  %v214_v49 = vsel %vm206_vm4, -inf, %v177_v39  ;;  %v218_v50 = vsel %vm210_vm5, -inf, %v181_v40 }
  0xfc   :  { %v300_v51 = vpack.c.bf16 %v214_v49, %v214_v49  ;;  %v304_v52 = vpack.c.bf16 %v218_v50, %v218_v50  ;;  %v217_v53 = vsel %vm209_vm6, -inf, %v180_v45  ;;  %v221_v54 = vsel %vm213_vm7, -inf, %v184_v46 }
  0xfd   :  { %257 = vst.msk [vmem:[#allocation2 + $0x8] sm:$0xf] %vm254_vm2, %v302_v47  ;;  %261 = vst.msk [vmem:[#allocation2 + $0x18] sm:$0xf] %vm254_vm2, %v306_v48  ;;  %v303_v55 = vpack.c.bf16 %v217_v53, %v217_v53  ;;  %v307_v56 = vpack.c.bf16 %v221_v54, %v221_v54  ;;  %v178_v57 = vsub.f32 %v163_v41, %v291_v23 }
  0xfe   :  { %v182_v58 = vsub.f32 %v167_v42, %v291_v23  ;;  %255 = vst.msk [vmem:[#allocation2] sm:$0xf] %vm254_vm2, %v300_v51  ;;  %259 = vst.msk [vmem:[#allocation2 + $0x10] sm:$0xf] %vm254_vm2, %v304_v52 }
  0xff   :  { %258 = vst.msk [vmem:[#allocation2 + $0xc] sm:$0xf] %vm254_vm2, %v303_v55  ;;  %262 = vst.msk [vmem:[#allocation2 + $0x1c] sm:$0xf] %vm254_vm2, %v307_v56  ;;  %v215_v59 = vsel %vm207_vm8, -inf, %v178_v57 }
 0x100   :  { %v219_v60 = vsel %vm211_vm9, -inf, %v182_v58  ;;  %v301_v61 = vpack.c.bf16 %v215_v59, %v215_v59 }
 0x101   :  { %v305_v62 = vpack.c.bf16 %v219_v60, %v219_v60 }
 0x102   :  { %256 = vst.msk [vmem:[#allocation2 + $0x4] sm:$0xf] %vm254_vm2, %v301_v61 }
 0x103   :  { %260 = vst.msk [vmem:[#allocation2 + $0x14] sm:$0xf] %vm254_vm2, %v305_v62 }
 0x104   :  { %370 = shalt.err (!%p367_p4)
}
 0x105   :  { %s371_s5 = scalar_lea.hbm %s498_s3, 512 }
 0x106   :  { %p372_p5 = scmp.ne.s32.totalorder %s498_s3, %s371_s5  ;;  %p375_p6 = scmp.lt.u32.totalorder %s371_s5, %s498_s3 }
 0x108   :  { %p377_p7 = pnand %p375_p6, %p372_p5 }
 0x10a   :  { %380 = shalt.err (!%p377_p7)
}
 0x10b   :  { %s384_s10 = smov 64   ;;  %s385_s11 = smov 4  }
 0x10c   :  { %274 = dma.vmem_to_hbm [thread:$0]  %s269_s28, 512, %s498_s3, [#allocation3], %s384_s10, %s384_s10, %s385_s11  }
 0x10d   :  { %381 = dma.done.wait [#allocation3], 512  }
 0x10e   :  { %382 = vsyncadd [#allocation3], 4294966784 }
 0x10f   :  { %278 = vsyncpa [#allocation3], 1 }

</bundles_post_ra>
